<compile_context>
chip_gen: v7x
topology: tpu7x:2x2x1
jax: 0.10.0
libtpu: 0.0.40
codegen_flags: <defaults>
</compile_context>

<pallas_src>
import functools
import math

import jax
import jax.numpy as jnp
from jax.experimental import pallas as pl
from jax.experimental.pallas import tpu as pltpu


# ---------------------------------------------------------------------------
# shift_dim: identical semantics to VideoGPT's shift_dim (move src dim to dest)
# Only used by the degenerate fallback path and by the pure-JAX reference.
# ---------------------------------------------------------------------------
def shift_dim(x, src_dim=-1, dest_dim=-1):
    n = x.ndim
    if src_dim < 0:
        src_dim += n
    if dest_dim < 0:
        dest_dim += n
    dims = list(range(n))
    dims.pop(src_dim)
    perm = []
    ctr = 0
    for i in range(n):
        if i == dest_dim:
            perm.append(src_dim)
        else:
            perm.append(dims[ctr])
            ctr += 1
    return jnp.transpose(x, perm)


# ---------------------------------------------------------------------------
# Pallas kernel: grouped scaled-dot-product attention on a (Bt, L, G) block.
# G = n_groups * head_dim; each lane group of width head_dim is an independent
# attention problem over the L (sublane) axis.
# ---------------------------------------------------------------------------
def _axial_sdpa_kernel(q_ref, k_ref, v_ref, o_ref, *, head_dim):
    g_total = q_ref.shape[-1]
    n_groups = g_total // head_dim
    scale = jnp.float32(1.0 / math.sqrt(head_dim))

    # Storage dtype straight into the MXU (bf16 runs at native rate; no
    # Bt*L*G cast/mul VALU work).  Scores come out f32 via
    # preferred_element_type and are scaled there.
    q = q_ref[...]
    k = k_ref[...]
    v = v_ref[...]

    outs = []
    for g in range(n_groups):                       # static unroll over groups
        lo = g * head_dim
        hi = lo + head_dim
        qg = q[..., lo:hi]                          # (Bt, L, C)
        kg = k[..., lo:hi]
        vg = v[..., lo:hi]

        # s[b] = q[b] @ k[b]^T, contracting the last axis of both operands so
        # no k-transpose relayout is materialized.
        s = jnp.einsum("blc,bmc->blm", qg, kg,
                       preferred_element_type=jnp.float32)      # (Bt, L, L)
        s = s * scale

        # Numerically stable softmax with deferred normalization.
        m = jnp.max(s, axis=-1, keepdims=True)
        p = jnp.exp(s - m)
        denom = jnp.sum(p, axis=-1, keepdims=True)              # (Bt, L, 1)

        og = jnp.einsum("blm,bmc->blc", p.astype(vg.dtype), vg,
                        preferred_element_type=jnp.float32)     # (Bt, L, C)

        # EUP approximate reciprocal + one Newton-Raphson step (~f32 accurate;
        # denom >= 1 so this is safe), broadcast over C.
        inv = pl.reciprocal(denom, approx=True)
        inv = inv * (2.0 - denom * inv)
        outs.append(og * inv)

    out = outs[0] if n_groups == 1 else jnp.concatenate(outs, axis=-1)
    o_ref[...] = out.astype(o_ref.dtype)            # single lane-dense store


# ---------------------------------------------------------------------------
# VMEM sizing (generation-aware) and block-row selection
# ---------------------------------------------------------------------------
def _tpu_vmem_capacity_bytes():
    try:
        return int(pltpu.get_tpu_info().vmem_capacity_bytes)
    except Exception:
        return 64 * 1024 * 1024          # conservative: v7x per-TensorCore size


def _vmem_budget_and_limit():
    cap = _tpu_vmem_capacity_bytes()
    if cap >= 96 * 1024 * 1024:          # v5e / v6e: 128 MiB physical VMEM
        limit = 80 * 1024 * 1024
    else:                                # v7x: 64 MiB physical per TensorCore
        limit = 40 * 1024 * 1024
    budget = int(limit * 0.7)            # headroom for Mosaic scratch / spills
    return budget, limit


def _choose_block_rows(n_rows, seq_len, packed_dim, itemsize, budget):
    """How many independent attention rows (leading-dim) per grid step."""
    # Double-buffered q/k/v/out I/O blocks.
    io_bytes = 4 * 2 * seq_len * packed_dim * itemsize
    # In-kernel values: loaded q/k/v, f32 group outputs, (L,L) scores/probs.
    tmp_bytes = (3 * seq_len * packed_dim * itemsize
                 + 4 * seq_len * packed_dim
                 + 4 * seq_len * seq_len * 4)
    per_row = io_bytes + tmp_bytes
    bt = max(1, budget // max(per_row, 1))
    # Keep >= ~4 grid steps (>= 2x TensorCores on v7x) so the parallel grid
    # axis shards across cores and the software pipeline has work to overlap.
    bt = min(bt, max(1, (n_rows + 3) // 4), n_rows, 4096)
    if bt >= 8:
        bt -= bt % 8
    return max(bt, 1)


def _grouped_sdpa(q, k, v, head_dim):
    """Batched grouped attention on (B, L, G) arrays, G = n_groups*head_dim."""
    b, seq_len, packed = q.shape
    assert packed % head_dim == 0
    budget, limit = _vmem_budget_and_limit()
    bt = _choose_block_rows(b, seq_len, packed, q.dtype.itemsize, budget)
    grid = (pl.cdiv(b, bt),)
    block = pl.BlockSpec((bt, seq_len, packed), lambda i: (i, 0, 0))
    kernel = functools.partial(_axial_sdpa_kernel, head_dim=head_dim)
    # TODO(synk): for very large L (>~512) add a kv grid axis with online
    # softmax (flash pattern) so the (L, L) temporaries stay bounded; likewise
    # tile the group axis when a single (L, G) row exceeds the VMEM budget.
    return pl.pallas_call(
        kernel,
        out_shape=jax.ShapeDtypeStruct((b, seq_len, packed), q.dtype),
        grid_spec=pltpu.PrefetchScalarGridSpec(
            num_scalar_prefetch=0,
            grid=grid,
            in_specs=[block, block, block],
            out_specs=block,
        ),
        compiler_params=pltpu.CompilerParams(
            dimension_semantics=("parallel",),
            vmem_limit_bytes=limit,
        ),
    )(q, k, v)


# ---------------------------------------------------------------------------
# NDimAxialAttention forward (JAX glue: free reshapes only in the common case)
# ---------------------------------------------------------------------------
class NDimAxialAttention:
    def __init__(self, shape, axial_dim=-1):
        self.shape = shape
        self.n_dim = len(shape)
        if axial_dim < 0:
            axial_dim = self.n_dim + axial_dim
        self.axial_dim = axial_dim

    def __call__(self, q, k, v, decode_step=None, decode_idx=None):
        ad = self.axial_dim                 # raw dim index, per the spec
        r = q.ndim

        if ad >= r - 1:
            # Degenerate case: axial dim is the channel dim.  The zero-copy
            # reshape trick needs the channel dim last, so fall back to the
            # explicit transpose path (single attention group).
            qf = shift_dim(q, ad, -2)
            kf = shift_dim(k, ad, -2)
            vf = shift_dim(v, ad, -2)
            old_shape = vf.shape
            out = _grouped_sdpa(qf.reshape((-1,) + qf.shape[-2:]),
                                kf.reshape((-1,) + kf.shape[-2:]),
                                vf.reshape((-1,) + vf.shape[-2:]),
                                head_dim=old_shape[-1])
            out = out.reshape(old_shape)
            return shift_dim(out, -2, ad)

        # Fast path (usual case): dims strictly after the axial dim are
        # contiguous with the channel dim, so shift_dim + flatten is equivalent
        # to a free reshape packing them into the lane axis as `grp`
        # independent head_dim-wide groups.  No HBM transposes.
        shape = q.shape
        seq_len = shape[ad]
        head_dim = shape[-1]
        pre = int(math.prod(shape[:ad]))
        grp = int(math.prod(shape[ad + 1:-1]))
        packed = grp * head_dim

        qf = q.reshape(pre, seq_len, packed)
        kf = k.reshape(pre, seq_len, packed)
        vf = v.reshape(pre, seq_len, packed)
        out = _grouped_sdpa(qf, kf, vf, head_dim=head_dim)
        return out.reshape(shape)


# ---------------------------------------------------------------------------
# Pure-JAX reference that mirrors the PyTorch forward literally
# (shift_dim -> flatten -> softmax(QK^T/sqrt(d)) V -> view -> shift back).
# ---------------------------------------------------------------------------
def _reference(q, k, v, axial_dim_normalized):
    ad = axial_dim_normalized
    qf = shift_dim(q, ad, -2)
    qf = qf.reshape((-1,) + qf.shape[-2:])
    kf = shift_dim(k, ad, -2)
    kf = kf.reshape((-1,) + kf.shape[-2:])
    vf = shift_dim(v, ad, -2)
    old_shape = vf.shape
    vf = vf.reshape((-1,) + vf.shape[-2:])

    attn = jnp.einsum("bld,bmd->blm", qf, kf,
                      precision=jax.lax.Precision.HIGHEST)
    attn = attn / math.sqrt(qf.shape[-1])
    attn = jax.nn.softmax(attn, axis=-1)
    out = jnp.einsum("blm,bmd->bld", attn, vf,
                     precision=jax.lax.Precision.HIGHEST)
    out = out.reshape(old_shape)
    return shift_dim(out, -2, ad)


if __name__ == "__main__":
    key = jax.random.PRNGKey(0)

    # Case 1: q/k/v (batch=2, 16, 8, channels=32), shape=(16, 8), axial_dim=-1
    # -> normalized raw dim 1 (the 16-axis), exactly as the spec's __init__.
    kq, kk, kv, key = jax.random.split(key, 4)
    q = jax.random.normal(kq, (2, 16, 8, 32), dtype=jnp.float32)
    k = jax.random.normal(kk, (2, 16, 8, 32), dtype=jnp.float32)
    v = jax.random.normal(kv, (2, 16, 8, 32), dtype=jnp.float32)
    mod = NDimAxialAttention(shape=(16, 8), axial_dim=-1)
    out = jax.block_until_ready(jax.jit(mod)(q, k, v))
    ref = _reference(q, k, v, mod.axial_dim)
    assert out.shape == q.shape
    assert jnp.allclose(out, ref, atol=5e-3, rtol=5e-3), \
        float(jnp.max(jnp.abs(out - ref)))

    # Case 2: higher-rank input (batch=2, 8, 4, 6, channels=16), axial_dim=1.
    kq, kk, kv, key = jax.random.split(key, 4)
    q2 = jax.random.normal(kq, (2, 8, 4, 6, 16), dtype=jnp.float32)
    k2 = jax.random.normal(kk, (2, 8, 4, 6, 16), dtype=jnp.float32)
    v2 = jax.random.normal(kv, (2, 8, 4, 6, 16), dtype=jnp.float32)
    mod2 = NDimAxialAttention(shape=(8, 4, 6), axial_dim=1)
    out2 = jax.block_until_ready(jax.jit(mod2)(q2, k2, v2))
    ref2 = _reference(q2, k2, v2, mod2.axial_dim)
    assert out2.shape == q2.shape
    assert jnp.allclose(out2, ref2, atol=5e-3, rtol=5e-3), \
        float(jnp.max(jnp.abs(out2 - ref2)))

    print("KERNEL_OK")
</pallas_src>

<mosaic_0001>
module attributes {stable_mosaic.version = 11 : i64} {
  func.func @_axial_sdpa_kernel(%arg0: i32, %arg1: memref<1x16x256xf32, #tpu.memory_space<vmem>>, %arg2: memref<1x16x256xf32, #tpu.memory_space<vmem>>, %arg3: memref<1x16x256xf32, #tpu.memory_space<vmem>>, %arg4: memref<1x16x256xf32, #tpu.memory_space<vmem>>) attributes {dimension_semantics = [#tpu.dimension_semantics<parallel>], iteration_bounds = array<i64: 2>, scalar_prefetch = 0 : i64, scratch_operands = 0 : i64, tpu.core_type = #tpu.core_type<tc>, window_params = [{transform_indices = @transform_0, window_bounds = array<i64: 1, 16, 256>}, {transform_indices = @transform_1, window_bounds = array<i64: 1, 16, 256>}, {transform_indices = @transform_2, window_bounds = array<i64: 1, 16, 256>}, {transform_indices = @transform_3, window_bounds = array<i64: 1, 16, 256>}]} {
    %c0 = arith.constant 0 : index
    %c0_0 = arith.constant 0 : index
    %c0_1 = arith.constant 0 : index
    %0 = vector.load %arg1[%c0, %c0_0, %c0_1] : memref<1x16x256xf32, #tpu.memory_space<vmem>>, vector<1x16x256xf32>
    %c0_2 = arith.constant 0 : index
    %c0_3 = arith.constant 0 : index
    %c0_4 = arith.constant 0 : index
    %1 = vector.load %arg2[%c0_2, %c0_3, %c0_4] : memref<1x16x256xf32, #tpu.memory_space<vmem>>, vector<1x16x256xf32>
    %c0_5 = arith.constant 0 : index
    %c0_6 = arith.constant 0 : index
    %c0_7 = arith.constant 0 : index
    %2 = vector.load %arg3[%c0_5, %c0_6, %c0_7] : memref<1x16x256xf32, #tpu.memory_space<vmem>>, vector<1x16x256xf32>
    %3 = vector.extract_strided_slice %0 {offsets = [0, 0, 0], sizes = [1, 16, 32], strides = [1, 1, 1]} : vector<1x16x256xf32> to vector<1x16x32xf32>
    %4 = vector.extract_strided_slice %1 {offsets = [0, 0, 0], sizes = [1, 16, 32], strides = [1, 1, 1]} : vector<1x16x256xf32> to vector<1x16x32xf32>
    %5 = vector.extract_strided_slice %2 {offsets = [0, 0, 0], sizes = [1, 16, 32], strides = [1, 1, 1]} : vector<1x16x256xf32> to vector<1x16x32xf32>
    "tpu.trace_start"() <{level = 10 : i32, message = "blc,bmc->blm"}> : () -> ()
    %cst = arith.constant dense<0.000000e+00> : vector<1x16x16xf32>
    %6 = tpu.matmul %3, %4, %cst {dimension_numbers = #tpu.dot_dimension_numbers<[2], [2], [1], [1], [0, 0, 0, 1, 1, 1], [0], [0]>} : vector<1x16x32xf32>, vector<1x16x32xf32>, vector<1x16x16xf32> -> vector<1x16x16xf32>
    "tpu.trace_stop"() : () -> ()
    %cst_8 = arith.constant 0.176776692 : f32
    %7 = vector.broadcast %cst_8 : f32 to vector<1x16x16xf32>
    %8 = arith.mulf %6, %7 : vector<1x16x16xf32>
    %cst_9 = arith.constant dense<0xFF800000> : vector<1x16xf32>
    %9 = vector.multi_reduction <maximumf>, %8, %cst_9 [2] : vector<1x16x16xf32> to vector<1x16xf32>
    %10 = vector.shape_cast %9 : vector<1x16xf32> to vector<1x16x1xf32>
    %11 = vector.broadcast %10 : vector<1x16x1xf32> to vector<1x16x16xf32>
    %12 = arith.subf %8, %11 : vector<1x16x16xf32>
    %13 = math.exp %12 : vector<1x16x16xf32>
    %cst_10 = arith.constant dense<0.000000e+00> : vector<1x16xf32>
    %14 = vector.multi_reduction <add>, %13, %cst_10 [2] : vector<1x16x16xf32> to vector<1x16xf32>
    %15 = vector.shape_cast %14 : vector<1x16xf32> to vector<1x16x1xf32>
    "tpu.trace_start"() <{level = 10 : i32, message = "blm,bmc->blc"}> : () -> ()
    %cst_11 = arith.constant dense<0.000000e+00> : vector<1x16x32xf32>
    %16 = tpu.matmul %13, %5, %cst_11 {dimension_numbers = #tpu.dot_dimension_numbers<[2], [1], [1], [2], [0, 0, 0, 1, 1, 2], [0], [0]>} : vector<1x16x16xf32>, vector<1x16x32xf32>, vector<1x16x32xf32> -> vector<1x16x32xf32>
    "tpu.trace_stop"() : () -> ()
    %17 = tpu.reciprocal %15 {approx = true} : vector<1x16x1xf32> -> vector<1x16x1xf32>
    %18 = arith.mulf %15, %17 : vector<1x16x1xf32>
    %cst_12 = arith.constant 2.000000e+00 : f32
    %19 = vector.broadcast %cst_12 : f32 to vector<1x16x1xf32>
    %20 = arith.subf %19, %18 : vector<1x16x1xf32>
    %21 = arith.mulf %17, %20 : vector<1x16x1xf32>
    %22 = vector.broadcast %21 : vector<1x16x1xf32> to vector<1x16x32xf32>
    %23 = arith.mulf %16, %22 : vector<1x16x32xf32>
    %24 = vector.extract_strided_slice %0 {offsets = [0, 0, 32], sizes = [1, 16, 32], strides = [1, 1, 1]} : vector<1x16x256xf32> to vector<1x16x32xf32>
    %25 = vector.extract_strided_slice %1 {offsets = [0, 0, 32], sizes = [1, 16, 32], strides = [1, 1, 1]} : vector<1x16x256xf32> to vector<1x16x32xf32>
    %26 = vector.extract_strided_slice %2 {offsets = [0, 0, 32], sizes = [1, 16, 32], strides = [1, 1, 1]} : vector<1x16x256xf32> to vector<1x16x32xf32>
    "tpu.trace_start"() <{level = 10 : i32, message = "blc,bmc->blm"}> : () -> ()
    %cst_13 = arith.constant dense<0.000000e+00> : vector<1x16x16xf32>
    %27 = tpu.matmul %24, %25, %cst_13 {dimension_numbers = #tpu.dot_dimension_numbers<[2], [2], [1], [1], [0, 0, 0, 1, 1, 1], [0], [0]>} : vector<1x16x32xf32>, vector<1x16x32xf32>, vector<1x16x16xf32> -> vector<1x16x16xf32>
    "tpu.trace_stop"() : () -> ()
    %cst_14 = arith.constant 0.176776692 : f32
    %28 = vector.broadcast %cst_14 : f32 to vector<1x16x16xf32>
    %29 = arith.mulf %27, %28 : vector<1x16x16xf32>
    %cst_15 = arith.constant dense<0xFF800000> : vector<1x16xf32>
    %30 = vector.multi_reduction <maximumf>, %29, %cst_15 [2] : vector<1x16x16xf32> to vector<1x16xf32>
    %31 = vector.shape_cast %30 : vector<1x16xf32> to vector<1x16x1xf32>
    %32 = vector.broadcast %31 : vector<1x16x1xf32> to vector<1x16x16xf32>
    %33 = arith.subf %29, %32 : vector<1x16x16xf32>
    %34 = math.exp %33 : vector<1x16x16xf32>
    %cst_16 = arith.constant dense<0.000000e+00> : vector<1x16xf32>
    %35 = vector.multi_reduction <add>, %34, %cst_16 [2] : vector<1x16x16xf32> to vector<1x16xf32>
    %36 = vector.shape_cast %35 : vector<1x16xf32> to vector<1x16x1xf32>
    "tpu.trace_start"() <{level = 10 : i32, message = "blm,bmc->blc"}> : () -> ()
    %cst_17 = arith.constant dense<0.000000e+00> : vector<1x16x32xf32>
    %37 = tpu.matmul %34, %26, %cst_17 {dimension_numbers = #tpu.dot_dimension_numbers<[2], [1], [1], [2], [0, 0, 0, 1, 1, 2], [0], [0]>} : vector<1x16x16xf32>, vector<1x16x32xf32>, vector<1x16x32xf32> -> vector<1x16x32xf32>
    "tpu.trace_stop"() : () -> ()
    %38 = tpu.reciprocal %36 {approx = true} : vector<1x16x1xf32> -> vector<1x16x1xf32>
    %39 = arith.mulf %36, %38 : vector<1x16x1xf32>
    %cst_18 = arith.constant 2.000000e+00 : f32
    %40 = vector.broadcast %cst_18 : f32 to vector<1x16x1xf32>
    %41 = arith.subf %40, %39 : vector<1x16x1xf32>
    %42 = arith.mulf %38, %41 : vector<1x16x1xf32>
    %43 = vector.broadcast %42 : vector<1x16x1xf32> to vector<1x16x32xf32>
    %44 = arith.mulf %37, %43 : vector<1x16x32xf32>
    %45 = vector.extract_strided_slice %0 {offsets = [0, 0, 64], sizes = [1, 16, 32], strides = [1, 1, 1]} : vector<1x16x256xf32> to vector<1x16x32xf32>
    %46 = vector.extract_strided_slice %1 {offsets = [0, 0, 64], sizes = [1, 16, 32], strides = [1, 1, 1]} : vector<1x16x256xf32> to vector<1x16x32xf32>
    %47 = vector.extract_strided_slice %2 {offsets = [0, 0, 64], sizes = [1, 16, 32], strides = [1, 1, 1]} : vector<1x16x256xf32> to vector<1x16x32xf32>
    "tpu.trace_start"() <{level = 10 : i32, message = "blc,bmc->blm"}> : () -> ()
    %cst_19 = arith.constant dense<0.000000e+00> : vector<1x16x16xf32>
    %48 = tpu.matmul %45, %46, %cst_19 {dimension_numbers = #tpu.dot_dimension_numbers<[2], [2], [1], [1], [0, 0, 0, 1, 1, 1], [0], [0]>} : vector<1x16x32xf32>, vector<1x16x32xf32>, vector<1x16x16xf32> -> vector<1x16x16xf32>
    "tpu.trace_stop"() : () -> ()
    %cst_20 = arith.constant 0.176776692 : f32
    %49 = vector.broadcast %cst_20 : f32 to vector<1x16x16xf32>
    %50 = arith.mulf %48, %49 : vector<1x16x16xf32>
    %cst_21 = arith.constant dense<0xFF800000> : vector<1x16xf32>
    %51 = vector.multi_reduction <maximumf>, %50, %cst_21 [2] : vector<1x16x16xf32> to vector<1x16xf32>
    %52 = vector.shape_cast %51 : vector<1x16xf32> to vector<1x16x1xf32>
    %53 = vector.broadcast %52 : vector<1x16x1xf32> to vector<1x16x16xf32>
    %54 = arith.subf %50, %53 : vector<1x16x16xf32>
    %55 = math.exp %54 : vector<1x16x16xf32>
    %cst_22 = arith.constant dense<0.000000e+00> : vector<1x16xf32>
    %56 = vector.multi_reduction <add>, %55, %cst_22 [2] : vector<1x16x16xf32> to vector<1x16xf32>
    %57 = vector.shape_cast %56 : vector<1x16xf32> to vector<1x16x1xf32>
    "tpu.trace_start"() <{level = 10 : i32, message = "blm,bmc->blc"}> : () -> ()
    %cst_23 = arith.constant dense<0.000000e+00> : vector<1x16x32xf32>
    %58 = tpu.matmul %55, %47, %cst_23 {dimension_numbers = #tpu.dot_dimension_numbers<[2], [1], [1], [2], [0, 0, 0, 1, 1, 2], [0], [0]>} : vector<1x16x16xf32>, vector<1x16x32xf32>, vector<1x16x32xf32> -> vector<1x16x32xf32>
    "tpu.trace_stop"() : () -> ()
    %59 = tpu.reciprocal %57 {approx = true} : vector<1x16x1xf32> -> vector<1x16x1xf32>
    %60 = arith.mulf %57, %59 : vector<1x16x1xf32>
    %cst_24 = arith.constant 2.000000e+00 : f32
    %61 = vector.broadcast %cst_24 : f32 to vector<1x16x1xf32>
    %62 = arith.subf %61, %60 : vector<1x16x1xf32>
    %63 = arith.mulf %59, %62 : vector<1x16x1xf32>
    %64 = vector.broadcast %63 : vector<1x16x1xf32> to vector<1x16x32xf32>
    %65 = arith.mulf %58, %64 : vector<1x16x32xf32>
    %66 = vector.extract_strided_slice %0 {offsets = [0, 0, 96], sizes = [1, 16, 32], strides = [1, 1, 1]} : vector<1x16x256xf32> to vector<1x16x32xf32>
    %67 = vector.extract_strided_slice %1 {offsets = [0, 0, 96], sizes = [1, 16, 32], strides = [1, 1, 1]} : vector<1x16x256xf32> to vector<1x16x32xf32>
    %68 = vector.extract_strided_slice %2 {offsets = [0, 0, 96], sizes = [1, 16, 32], strides = [1, 1, 1]} : vector<1x16x256xf32> to vector<1x16x32xf32>
    "tpu.trace_start"() <{level = 10 : i32, message = "blc,bmc->blm"}> : () -> ()
    %cst_25 = arith.constant dense<0.000000e+00> : vector<1x16x16xf32>
    %69 = tpu.matmul %66, %67, %cst_25 {dimension_numbers = #tpu.dot_dimension_numbers<[2], [2], [1], [1], [0, 0, 0, 1, 1, 1], [0], [0]>} : vector<1x16x32xf32>, vector<1x16x32xf32>, vector<1x16x16xf32> -> vector<1x16x16xf32>
    "tpu.trace_stop"() : () -> ()
    %cst_26 = arith.constant 0.176776692 : f32
    %70 = vector.broadcast %cst_26 : f32 to vector<1x16x16xf32>
    %71 = arith.mulf %69, %70 : vector<1x16x16xf32>
    %cst_27 = arith.constant dense<0xFF800000> : vector<1x16xf32>
    %72 = vector.multi_reduction <maximumf>, %71, %cst_27 [2] : vector<1x16x16xf32> to vector<1x16xf32>
    %73 = vector.shape_cast %72 : vector<1x16xf32> to vector<1x16x1xf32>
    %74 = vector.broadcast %73 : vector<1x16x1xf32> to vector<1x16x16xf32>
    %75 = arith.subf %71, %74 : vector<1x16x16xf32>
    %76 = math.exp %75 : vector<1x16x16xf32>
    %cst_28 = arith.constant dense<0.000000e+00> : vector<1x16xf32>
    %77 = vector.multi_reduction <add>, %76, %cst_28 [2] : vector<1x16x16xf32> to vector<1x16xf32>
    %78 = vector.shape_cast %77 : vector<1x16xf32> to vector<1x16x1xf32>
    "tpu.trace_start"() <{level = 10 : i32, message = "blm,bmc->blc"}> : () -> ()
    %cst_29 = arith.constant dense<0.000000e+00> : vector<1x16x32xf32>
    %79 = tpu.matmul %76, %68, %cst_29 {dimension_numbers = #tpu.dot_dimension_numbers<[2], [1], [1], [2], [0, 0, 0, 1, 1, 2], [0], [0]>} : vector<1x16x16xf32>, vector<1x16x32xf32>, vector<1x16x32xf32> -> vector<1x16x32xf32>
    "tpu.trace_stop"() : () -> ()
    %80 = tpu.reciprocal %78 {approx = true} : vector<1x16x1xf32> -> vector<1x16x1xf32>
    %81 = arith.mulf %78, %80 : vector<1x16x1xf32>
    %cst_30 = arith.constant 2.000000e+00 : f32
    %82 = vector.broadcast %cst_30 : f32 to vector<1x16x1xf32>
    %83 = arith.subf %82, %81 : vector<1x16x1xf32>
    %84 = arith.mulf %80, %83 : vector<1x16x1xf32>
    %85 = vector.broadcast %84 : vector<1x16x1xf32> to vector<1x16x32xf32>
    %86 = arith.mulf %79, %85 : vector<1x16x32xf32>
    %87 = vector.extract_strided_slice %0 {offsets = [0, 0, 128], sizes = [1, 16, 32], strides = [1, 1, 1]} : vector<1x16x256xf32> to vector<1x16x32xf32>
    %88 = vector.extract_strided_slice %1 {offsets = [0, 0, 128], sizes = [1, 16, 32], strides = [1, 1, 1]} : vector<1x16x256xf32> to vector<1x16x32xf32>
    %89 = vector.extract_strided_slice %2 {offsets = [0, 0, 128], sizes = [1, 16, 32], strides = [1, 1, 1]} : vector<1x16x256xf32> to vector<1x16x32xf32>
    "tpu.trace_start"() <{level = 10 : i32, message = "blc,bmc->blm"}> : () -> ()
    %cst_31 = arith.constant dense<0.000000e+00> : vector<1x16x16xf32>
    %90 = tpu.matmul %87, %88, %cst_31 {dimension_numbers = #tpu.dot_dimension_numbers<[2], [2], [1], [1], [0, 0, 0, 1, 1, 1], [0], [0]>} : vector<1x16x32xf32>, vector<1x16x32xf32>, vector<1x16x16xf32> -> vector<1x16x16xf32>
    "tpu.trace_stop"() : () -> ()
    %cst_32 = arith.constant 0.176776692 : f32
    %91 = vector.broadcast %cst_32 : f32 to vector<1x16x16xf32>
    %92 = arith.mulf %90, %91 : vector<1x16x16xf32>
    %cst_33 = arith.constant dense<0xFF800000> : vector<1x16xf32>
    %93 = vector.multi_reduction <maximumf>, %92, %cst_33 [2] : vector<1x16x16xf32> to vector<1x16xf32>
    %94 = vector.shape_cast %93 : vector<1x16xf32> to vector<1x16x1xf32>
    %95 = vector.broadcast %94 : vector<1x16x1xf32> to vector<1x16x16xf32>
    %96 = arith.subf %92, %95 : vector<1x16x16xf32>
    %97 = math.exp %96 : vector<1x16x16xf32>
    %cst_34 = arith.constant dense<0.000000e+00> : vector<1x16xf32>
    %98 = vector.multi_reduction <add>, %97, %cst_34 [2] : vector<1x16x16xf32> to vector<1x16xf32>
    %99 = vector.shape_cast %98 : vector<1x16xf32> to vector<1x16x1xf32>
    "tpu.trace_start"() <{level = 10 : i32, message = "blm,bmc->blc"}> : () -> ()
    %cst_35 = arith.constant dense<0.000000e+00> : vector<1x16x32xf32>
    %100 = tpu.matmul %97, %89, %cst_35 {dimension_numbers = #tpu.dot_dimension_numbers<[2], [1], [1], [2], [0, 0, 0, 1, 1, 2], [0], [0]>} : vector<1x16x16xf32>, vector<1x16x32xf32>, vector<1x16x32xf32> -> vector<1x16x32xf32>
    "tpu.trace_stop"() : () -> ()
    %101 = tpu.reciprocal %99 {approx = true} : vector<1x16x1xf32> -> vector<1x16x1xf32>
    %102 = arith.mulf %99, %101 : vector<1x16x1xf32>
    %cst_36 = arith.constant 2.000000e+00 : f32
    %103 = vector.broadcast %cst_36 : f32 to vector<1x16x1xf32>
    %104 = arith.subf %103, %102 : vector<1x16x1xf32>
    %105 = arith.mulf %101, %104 : vector<1x16x1xf32>
    %106 = vector.broadcast %105 : vector<1x16x1xf32> to vector<1x16x32xf32>
    %107 = arith.mulf %100, %106 : vector<1x16x32xf32>
    %108 = vector.extract_strided_slice %0 {offsets = [0, 0, 160], sizes = [1, 16, 32], strides = [1, 1, 1]} : vector<1x16x256xf32> to vector<1x16x32xf32>
    %109 = vector.extract_strided_slice %1 {offsets = [0, 0, 160], sizes = [1, 16, 32], strides = [1, 1, 1]} : vector<1x16x256xf32> to vector<1x16x32xf32>
    %110 = vector.extract_strided_slice %2 {offsets = [0, 0, 160], sizes = [1, 16, 32], strides = [1, 1, 1]} : vector<1x16x256xf32> to vector<1x16x32xf32>
    "tpu.trace_start"() <{level = 10 : i32, message = "blc,bmc->blm"}> : () -> ()
    %cst_37 = arith.constant dense<0.000000e+00> : vector<1x16x16xf32>
    %111 = tpu.matmul %108, %109, %cst_37 {dimension_numbers = #tpu.dot_dimension_numbers<[2], [2], [1], [1], [0, 0, 0, 1, 1, 1], [0], [0]>} : vector<1x16x32xf32>, vector<1x16x32xf32>, vector<1x16x16xf32> -> vector<1x16x16xf32>
    "tpu.trace_stop"() : () -> ()
    %cst_38 = arith.constant 0.176776692 : f32
    %112 = vector.broadcast %cst_38 : f32 to vector<1x16x16xf32>
    %113 = arith.mulf %111, %112 : vector<1x16x16xf32>
    %cst_39 = arith.constant dense<0xFF800000> : vector<1x16xf32>
    %114 = vector.multi_reduction <maximumf>, %113, %cst_39 [2] : vector<1x16x16xf32> to vector<1x16xf32>
    %115 = vector.shape_cast %114 : vector<1x16xf32> to vector<1x16x1xf32>
    %116 = vector.broadcast %115 : vector<1x16x1xf32> to vector<1x16x16xf32>
    %117 = arith.subf %113, %116 : vector<1x16x16xf32>
    %118 = math.exp %117 : vector<1x16x16xf32>
    %cst_40 = arith.constant dense<0.000000e+00> : vector<1x16xf32>
    %119 = vector.multi_reduction <add>, %118, %cst_40 [2] : vector<1x16x16xf32> to vector<1x16xf32>
    %120 = vector.shape_cast %119 : vector<1x16xf32> to vector<1x16x1xf32>
    "tpu.trace_start"() <{level = 10 : i32, message = "blm,bmc->blc"}> : () -> ()
    %cst_41 = arith.constant dense<0.000000e+00> : vector<1x16x32xf32>
    %121 = tpu.matmul %118, %110, %cst_41 {dimension_numbers = #tpu.dot_dimension_numbers<[2], [1], [1], [2], [0, 0, 0, 1, 1, 2], [0], [0]>} : vector<1x16x16xf32>, vector<1x16x32xf32>, vector<1x16x32xf32> -> vector<1x16x32xf32>
    "tpu.trace_stop"() : () -> ()
    %122 = tpu.reciprocal %120 {approx = true} : vector<1x16x1xf32> -> vector<1x16x1xf32>
    %123 = arith.mulf %120, %122 : vector<1x16x1xf32>
    %cst_42 = arith.constant 2.000000e+00 : f32
    %124 = vector.broadcast %cst_42 : f32 to vector<1x16x1xf32>
    %125 = arith.subf %124, %123 : vector<1x16x1xf32>
    %126 = arith.mulf %122, %125 : vector<1x16x1xf32>
    %127 = vector.broadcast %126 : vector<1x16x1xf32> to vector<1x16x32xf32>
    %128 = arith.mulf %121, %127 : vector<1x16x32xf32>
    %129 = vector.extract_strided_slice %0 {offsets = [0, 0, 192], sizes = [1, 16, 32], strides = [1, 1, 1]} : vector<1x16x256xf32> to vector<1x16x32xf32>
    %130 = vector.extract_strided_slice %1 {offsets = [0, 0, 192], sizes = [1, 16, 32], strides = [1, 1, 1]} : vector<1x16x256xf32> to vector<1x16x32xf32>
    %131 = vector.extract_strided_slice %2 {offsets = [0, 0, 192], sizes = [1, 16, 32], strides = [1, 1, 1]} : vector<1x16x256xf32> to vector<1x16x32xf32>
    "tpu.trace_start"() <{level = 10 : i32, message = "blc,bmc->blm"}> : () -> ()
    %cst_43 = arith.constant dense<0.000000e+00> : vector<1x16x16xf32>
    %132 = tpu.matmul %129, %130, %cst_43 {dimension_numbers = #tpu.dot_dimension_numbers<[2], [2], [1], [1], [0, 0, 0, 1, 1, 1], [0], [0]>} : vector<1x16x32xf32>, vector<1x16x32xf32>, vector<1x16x16xf32> -> vector<1x16x16xf32>
    "tpu.trace_stop"() : () -> ()
    %cst_44 = arith.constant 0.176776692 : f32
    %133 = vector.broadcast %cst_44 : f32 to vector<1x16x16xf32>
    %134 = arith.mulf %132, %133 : vector<1x16x16xf32>
    %cst_45 = arith.constant dense<0xFF800000> : vector<1x16xf32>
    %135 = vector.multi_reduction <maximumf>, %134, %cst_45 [2] : vector<1x16x16xf32> to vector<1x16xf32>
    %136 = vector.shape_cast %135 : vector<1x16xf32> to vector<1x16x1xf32>
    %137 = vector.broadcast %136 : vector<1x16x1xf32> to vector<1x16x16xf32>
    %138 = arith.subf %134, %137 : vector<1x16x16xf32>
    %139 = math.exp %138 : vector<1x16x16xf32>
    %cst_46 = arith.constant dense<0.000000e+00> : vector<1x16xf32>
    %140 = vector.multi_reduction <add>, %139, %cst_46 [2] : vector<1x16x16xf32> to vector<1x16xf32>
    %141 = vector.shape_cast %140 : vector<1x16xf32> to vector<1x16x1xf32>
    "tpu.trace_start"() <{level = 10 : i32, message = "blm,bmc->blc"}> : () -> ()
    %cst_47 = arith.constant dense<0.000000e+00> : vector<1x16x32xf32>
    %142 = tpu.matmul %139, %131, %cst_47 {dimension_numbers = #tpu.dot_dimension_numbers<[2], [1], [1], [2], [0, 0, 0, 1, 1, 2], [0], [0]>} : vector<1x16x16xf32>, vector<1x16x32xf32>, vector<1x16x32xf32> -> vector<1x16x32xf32>
    "tpu.trace_stop"() : () -> ()
    %143 = tpu.reciprocal %141 {approx = true} : vector<1x16x1xf32> -> vector<1x16x1xf32>
    %144 = arith.mulf %141, %143 : vector<1x16x1xf32>
    %cst_48 = arith.constant 2.000000e+00 : f32
    %145 = vector.broadcast %cst_48 : f32 to vector<1x16x1xf32>
    %146 = arith.subf %145, %144 : vector<1x16x1xf32>
    %147 = arith.mulf %143, %146 : vector<1x16x1xf32>
    %148 = vector.broadcast %147 : vector<1x16x1xf32> to vector<1x16x32xf32>
    %149 = arith.mulf %142, %148 : vector<1x16x32xf32>
    %150 = vector.extract_strided_slice %0 {offsets = [0, 0, 224], sizes = [1, 16, 32], strides = [1, 1, 1]} : vector<1x16x256xf32> to vector<1x16x32xf32>
    %151 = vector.extract_strided_slice %1 {offsets = [0, 0, 224], sizes = [1, 16, 32], strides = [1, 1, 1]} : vector<1x16x256xf32> to vector<1x16x32xf32>
    %152 = vector.extract_strided_slice %2 {offsets = [0, 0, 224], sizes = [1, 16, 32], strides = [1, 1, 1]} : vector<1x16x256xf32> to vector<1x16x32xf32>
    "tpu.trace_start"() <{level = 10 : i32, message = "blc,bmc->blm"}> : () -> ()
    %cst_49 = arith.constant dense<0.000000e+00> : vector<1x16x16xf32>
    %153 = tpu.matmul %150, %151, %cst_49 {dimension_numbers = #tpu.dot_dimension_numbers<[2], [2], [1], [1], [0, 0, 0, 1, 1, 1], [0], [0]>} : vector<1x16x32xf32>, vector<1x16x32xf32>, vector<1x16x16xf32> -> vector<1x16x16xf32>
    "tpu.trace_stop"() : () -> ()
    %cst_50 = arith.constant 0.176776692 : f32
    %154 = vector.broadcast %cst_50 : f32 to vector<1x16x16xf32>
    %155 = arith.mulf %153, %154 : vector<1x16x16xf32>
    %cst_51 = arith.constant dense<0xFF800000> : vector<1x16xf32>
    %156 = vector.multi_reduction <maximumf>, %155, %cst_51 [2] : vector<1x16x16xf32> to vector<1x16xf32>
    %157 = vector.shape_cast %156 : vector<1x16xf32> to vector<1x16x1xf32>
    %158 = vector.broadcast %157 : vector<1x16x1xf32> to vector<1x16x16xf32>
    %159 = arith.subf %155, %158 : vector<1x16x16xf32>
    %160 = math.exp %159 : vector<1x16x16xf32>
    %cst_52 = arith.constant dense<0.000000e+00> : vector<1x16xf32>
    %161 = vector.multi_reduction <add>, %160, %cst_52 [2] : vector<1x16x16xf32> to vector<1x16xf32>
    %162 = vector.shape_cast %161 : vector<1x16xf32> to vector<1x16x1xf32>
    "tpu.trace_start"() <{level = 10 : i32, message = "blm,bmc->blc"}> : () -> ()
    %cst_53 = arith.constant dense<0.000000e+00> : vector<1x16x32xf32>
    %163 = tpu.matmul %160, %152, %cst_53 {dimension_numbers = #tpu.dot_dimension_numbers<[2], [1], [1], [2], [0, 0, 0, 1, 1, 2], [0], [0]>} : vector<1x16x16xf32>, vector<1x16x32xf32>, vector<1x16x32xf32> -> vector<1x16x32xf32>
    "tpu.trace_stop"() : () -> ()
    %164 = tpu.reciprocal %162 {approx = true} : vector<1x16x1xf32> -> vector<1x16x1xf32>
    %165 = arith.mulf %162, %164 : vector<1x16x1xf32>
    %cst_54 = arith.constant 2.000000e+00 : f32
    %166 = vector.broadcast %cst_54 : f32 to vector<1x16x1xf32>
    %167 = arith.subf %166, %165 : vector<1x16x1xf32>
    %168 = arith.mulf %164, %167 : vector<1x16x1xf32>
    %169 = vector.broadcast %168 : vector<1x16x1xf32> to vector<1x16x32xf32>
    %170 = arith.mulf %163, %169 : vector<1x16x32xf32>
    %171 = tpu.concatenate %23, %44, %65, %86, %107, %128, %149, %170 in 2 : vector<1x16x32xf32>, vector<1x16x32xf32>, vector<1x16x32xf32>, vector<1x16x32xf32>, vector<1x16x32xf32>, vector<1x16x32xf32>, vector<1x16x32xf32>, vector<1x16x32xf32> -> vector<1x16x256xf32>
    %c0_55 = arith.constant 0 : index
    %c0_56 = arith.constant 0 : index
    %c0_57 = arith.constant 0 : index
    %172 = vector.load %arg4[%c0_55, %c0_56, %c0_57] : memref<1x16x256xf32, #tpu.memory_space<vmem>>, vector<1x16x256xf32>
    tpu.vector_store %arg4[%c0_55, %c0_56, %c0_57], %171 {strides = array<i32>} : memref<1x16x256xf32, #tpu.memory_space<vmem>>, vector<1x16x256xf32>,
    return
  }
  func.func @transform_0(%arg0: i32) -> (i32, i32, i32) {
    %c0_i32 = arith.constant 0 : i32
    %c0_i32_0 = arith.constant 0 : i32
    %c0_i32_1 = arith.constant 0 : i32
    return %arg0, %c0_i32, %c0_i32_0 : i32, i32, i32
  }
  func.func @transform_1(%arg0: i32) -> (i32, i32, i32) {
    %c0_i32 = arith.constant 0 : i32
    %c0_i32_0 = arith.constant 0 : i32
    %c0_i32_1 = arith.constant 0 : i32
    return %arg0, %c0_i32, %c0_i32_0 : i32, i32, i32
  }
  func.func @transform_2(%arg0: i32) -> (i32, i32, i32) {
    %c0_i32 = arith.constant 0 : i32
    %c0_i32_0 = arith.constant 0 : i32
    %c0_i32_1 = arith.constant 0 : i32
    return %arg0, %c0_i32, %c0_i32_0 : i32, i32, i32
  }
  func.func @transform_3(%arg0: i32) -> (i32, i32, i32) {
    %c0_i32 = arith.constant 0 : i32
    %c0_i32_0 = arith.constant 0 : i32
    %c0_i32_1 = arith.constant 0 : i32
    return %arg0, %c0_i32, %c0_i32_0 : i32, i32, i32
  }
}

</mosaic_0001>

<bundles_post_ra>
// kernel: _unnamed_function_.1
= control target key start
LH: loop header
LB: loop body
LE: loop exit
PB: predicated region body
PF: predicated region fallthrough
CT: control target
= control target key end

     0   :  { %s2507_s12 = smov 0   ;;  %s2834_s0 = inlined_call_operand.vmem [shape: f32[2,16,256], index: 0, kind: input, shape index: {}]   ;;  %s2835_s1 = inlined_call_operand.vmem [shape: f32[2,16,256], index: 1, kind: input, shape index: {}]   ;;  %s2836_s2 = inlined_call_operand.vmem [shape: f32[2,16,256], index: 2, kind: input, shape index: {}]   ;;  %s2837_s3 = inlined_call_operand.vmem [shape: f32[2,16,256], index: 3, kind: output, shape index: {}]  }
   0x1 LB: > { %s2018_s13 = sadd.s32 4294967295, %s2482_s12   ;;  %p2022_p0 = scmp.ge.s32.totalorder %s2482_s12, 1  ;;  %s2482_s12 = sphi %s2507_s12, %s13_s12  }
   0x2   : > { %p157_p1 = scmp.lt.s32.totalorder %s2482_s12, 3 }
   0x4   : > { %p158_p2 = pnand %p2022_p0, %p157_p1 }
   0x5   : > { %p191_p3 = scmp.lt.s32.totalorder (!%p158_p2), %s2018_s13, 1  ;;  %vm223_vm0 = vcmask (!%p158_p2), 261120   ;;  %s2484_s21 = smov (!%p158_p2), 96   ;;  %vm313_vm2 = vcmask (!%p158_p2), 130048   ;;  %vm1923_vm3 = vcmask (!%p158_p2), 523264   ;;  %vm1926_vm4 = vcmask (!%p158_p2), 785408  }
   0x6   : > { %161 = sbr.rel (%p158_p2) target bundleno = 3415 (0xd57), region = 32  ;;  %vm2525_vm1 = vmpackc.low (!%p158_p2), %vm223_vm0, %vm223_vm0  ;;  %s2485_s25 = smov (!%p158_p2), 64  }
   0x7   : > { %s2486_s26 = smov (!%p158_p2), 32  }
   0xd   : > { %s2841_s13 = smov (!%p191_p3, %s2018_s13), 1 }
   0xe   : > { %s2515_s14 = sshll.u32 %s2841_s13, 5 }
   0xf   : > { %s2521_s17 = scalar_lea.vmem %s2835_s1, %s2515_s14  ;;  %s2533_s20 = scalar_lea.vmem %s2834_s0, %s2515_s14 }
  0x10   : > { %v215_v1 = vld [vmem:[%s2521_s17] sm:$0xff]  ;;  %v217_v2 = vld [vmem:[%s2521_s17 + $0x10] sm:$0xff]  ;;  %s2563_s24 = scalar_lea.vmem %s2836_s2, %s2515_s14  ;;  %s210_s29 = scalar_lea.vmem %s2837_s3, %s2515_s14 }
  0x11   : > { %v2538_v3 = vld [vmem:[%s2533_s20] sm:$0xff]  ;;  %v2261_v4 = vpack.c.bf16 %v217_v2, %v215_v1  ;;  %v2547_v5 = vld [vmem:[%s2533_s20 + $0x10] sm:$0xff]  ;;  %v2551_v6 = vpack.i.bf16 %v217_v2, %v215_v1 }
  0x12   : > { %2153 = vmatprep.mubr.msk.f32.mxu0 %vm223_vm0, %v2538_v3  ;;  %v219_v13 = vld [vmem:[%s2563_s24] sm:$0xff]  ;;  %v221_v14 = vld [vmem:[%s2563_s24 + $0x10] sm:$0xff] }
  0x13   : > { %2263 = vmatprep.subr.msk.bf16.mxu0 %vm2525_vm1, %v2261_v4  ;;  %2353 = vrot.lane.b32.xlu1 %v2551_v6, %s2484_s21  ;;  %v2267_v15 = vpack.c.bf16 %v221_v14, %v219_v13  ;;  %v2571_v20 = vpack.i.bf16 %v221_v14, %v219_v13 }
  0x14   : > { %2266 = vmatpush3.bf16.xpose.msk.msra.mxu0 %vm2525_vm1, %v2261_v4 }
  0x15   : > { %2268 = vmatprep.subr.bf16.mxu1 %v2267_v15 }
  0x16   : > { %2270 = vmatpush3.bf16.msra.mxu1 %v2267_v15 }
  0x17   : > { %423 = vrot.lane.b32.xlu1 %v2538_v3, %s2484_s21 }
  0x1b   : > { %2154 = vmatmul.mubr.msk.f32.vlgmr.msra.gmra.mrb[0].mxu0 %vm223_vm0, %v2547_v5  ;;  %2358 = vrot.lane.b32.xlu1 %v2571_v20, %s2484_s21 }
  0x85   : > { %v2354_v16 = vpop.permute.xlu1 %2353 }
  0x86   : > { %v2356_v17 = vunpack.i.h.bf16 %v2354_v16  ;;  %v2355_v18 = vunpack.i.l.bf16 %v2354_v16 }
  0x88   : > { %v2271_v19 = vpack.c.bf16 %v2356_v17, %v2355_v18 }
  0x89   : > { %v424_v28 = vpop.permute.xlu1 %423 }
  0x8a   : > { %2273 = vmatprep.subr.msk.bf16.mxu1 %vm2525_vm1, %v2271_v19 }
  0x8d   : > { %v2359_v31 = vpop.permute.xlu1 %2358 }
  0x8e   : > { %v2361_v32 = vunpack.i.h.bf16 %v2359_v31  ;;  %v2360_v33 = vunpack.i.l.bf16 %v2359_v31  ;;  %v2650_v31 = vld [vmem:[%s2533_s20 + $0x8] sm:$0xff] }
  0x90   : > { %v2277_v34 = vpack.c.bf16 %v2361_v32, %v2360_v33  ;;  %v2655_v32 = vld [vmem:[%s2533_s20 + $0x18] sm:$0xff] }
  0x92   : > { %2278 = vmatprep.subr.bf16.mxu0 %v2277_v34 }
  0x93   : > { %2280 = vmatpush3.bf16.msra.mxu0 %v2277_v34 }
  0xee   : > { %v2155_v7 = vpop.f32.mrb[0].mxu0 }
  0xef   : > { %v302_v8 = vpop.f32.mrb[1].mxu0  ;;  %v312_v10 = vmul.f32 0.17677669, %v2155_v7 }
  0xf0   : > { %v311_v9 = vmul.f32 0.17677669, %v302_v8 }
  0xf1   : > { %v317_v12 = vsel %vm313_vm2, %v312_v10, -inf }
  0xf2   : > { %v314_v11 = vsel %vm313_vm2, %v311_v9, -inf }
  0xf3   : > { %315 = vmax.xlane.f32.xlu0 %v314_v11 }
  0xf7   : > { %318 = vmax.xlane.f32.xlu0 %v317_v12 }
 0x10d   : > { %425 = vrot.lane.b32.xlu0 %v2547_v5, %s2484_s21 }
 0x180   : > { %v316_v21 = vpop.xlane.xlu0 %315 }
 0x181   : > { %v320_v22 = vsub.f32 %v311_v9, %v316_v21 }
 0x183   : > { %v322_v23 = vmul.f32 1.442695, %v320_v22 }
 0x184   : > { %v319_v24 = vpop.xlane.xlu0 %318 }
 0x185   : > { %2412 = vpow2.f32 %v322_v23  ;;  %v321_v25 = vsub.f32 %v312_v10, %v319_v24 }
 0x187   : > { %v324_v26 = vmul.f32 1.442695, %v321_v25 }
 0x188   : > { %v426_v30 = vpop.permute.xlu0 %425 }
 0x189   : > { %2414 = vpow2.f32 %v324_v26 }
 0x18f   : > { %v2575_v27 = vpop.eup %2412 }
 0x190   : > { %2160 = vmatprep.mubr.msk.f32.mxu1 %vm313_vm2, %v2575_v27 }
 0x193   : > { %v2579_v29 = vpop.eup %2414 }
 0x194   : > { %2161 = vmatmul.mubr.msk.f32.vlgmr.msra.gmra.mrb[0].mxu1 %vm313_vm2, %v2579_v29 }
 0x195   : > { %2276 = vmatpush3.bf16.xpose.msk.msra.mxu1 %vm2525_vm1, %v2271_v19  ;;  %2167 = vmatprep.mubr.msk.f32.mxu1 %vm223_vm0, %v424_v28 }
 0x19c   : > { %2168 = vmatmul.mubr.msk.f32.vlgmr.msra.gmra.mrb[2].mxu1 %vm223_vm0, %v426_v30 }
 0x267   : > { %v2587_v35 = vpop.f32.mrb[0].mxu1 }
 0x268   : > { %v2589_v36 = vpop.f32.mrb[1].mxu1 }
 0x26f   : > { %v2169_v37 = vpop.f32.mrb[2].mxu1 }
 0x270   : > { %v515_v38 = vmul.f32 0.17677669, %v2169_v37  ;;  %v505_v39 = vpop.f32.mrb[3].mxu1 }
 0x271   : > { %v514_v40 = vmul.f32 0.17677669, %v505_v39 }
 0x272   : > { %v519_v41 = vsel %vm313_vm2, %v515_v38, -inf }
 0x273   : > { %520 = vmax.xlane.f32.xlu0 %v519_v41  ;;  %v516_v42 = vsel %vm313_vm2, %v514_v40, -inf }
 0x274   : > { %517 = vmax.xlane.f32.xlu1 %v516_v42  ;;  %v216_v42 = vld [vmem:[%s2521_s17 + $0x8] sm:$0xff] }
 0x285   : > { %633 = vrot.lane.b32.xlu1 %v2538_v3, %s2485_s25 }
 0x289   : > { %2363 = vrot.lane.b32.xlu0 %v2551_v6, %s2485_s25  ;;  %635 = vrot.lane.b32.xlu1 %v2547_v5, %s2485_s25 }
 0x28d   : > { %2368 = vrot.lane.b32.xlu1 %v2571_v20, %s2485_s25 }
 0x300   : > { %v521_v43 = vpop.xlane.xlu0 %520 }
 0x301   : > { %v523_v44 = vsub.f32 %v515_v38, %v521_v43  ;;  %v518_v45 = vpop.xlane.xlu1 %517  ;;  %v218_v43 = vld [vmem:[%s2521_s17 + $0x18] sm:$0xff] }
 0x302   : > { %v522_v46 = vsub.f32 %v514_v40, %v518_v45 }
 0x303   : > { %v526_v47 = vmul.f32 1.442695, %v523_v44 }
 0x304   : > { %v524_v48 = vmul.f32 1.442695, %v522_v46  ;;  %v2364_v49 = vpop.permute.xlu0 %2363  ;;  %v2301_v46 = vpack.c.bf16 %v218_v43, %v216_v42 }
 0x305   : > { %v2366_v50 = vunpack.i.h.bf16 %v2364_v49  ;;  %v2365_v51 = vunpack.i.l.bf16 %v2364_v49  ;;  %v634_v54 = vpop.permute.xlu1 %633 }
 0x306   : > { %2416 = vpow2.f32 %v524_v48 }
 0x307   : > { %2418 = vpow2.f32 %v526_v47  ;;  %v2281_v52 = vpack.c.bf16 %v2366_v50, %v2365_v51 }
 0x309   : > { %2283 = vmatprep.subr.msk.bf16.mxu0 %vm2525_vm1, %v2281_v52  ;;  %v636_v56 = vpop.permute.xlu1 %635 }
 0x30d   : > { %v2369_v57 = vpop.permute.xlu1 %2368 }
 0x30e   : > { %v2371_v58 = vunpack.i.h.bf16 %v2369_v57  ;;  %v2370_v59 = vunpack.i.l.bf16 %v2369_v57 }
 0x310   : > { %v2603_v53 = vpop.eup %2416  ;;  %v2287_v60 = vpack.c.bf16 %v2371_v58, %v2370_v59  ;;  %v220_v59 = vld [vmem:[%s2563_s24 + $0x8] sm:$0xff] }
 0x311   : > { %v2605_v55 = vpop.eup %2418  ;;  %2174 = vmatprep.mubr.msk.f32.mxu0 %vm313_vm2, %v2603_v53  ;;  %v528_v0 = vsel %vm313_vm2, %v2603_v53, 0.0 }
 0x312   : > { %2175 = vmatmul.mubr.msk.f32.vlgmr.msra.gmra.mrb[2].mxu0 %vm313_vm2, %v2605_v55  ;;  %2288 = vmatprep.subr.bf16.mxu1 %v2287_v60 }
 0x313   : > { %2286 = vmatpush3.bf16.xpose.msk.msra.mxu0 %vm2525_vm1, %v2281_v52  ;;  %2181 = vmatprep.mubr.msk.f32.mxu0 %vm223_vm0, %v634_v54 }
 0x314   : > { %2290 = vmatpush3.bf16.msra.mxu1 %v2287_v60  ;;  %v222_v60 = vld [vmem:[%s2563_s24 + $0x18] sm:$0xff] }
 0x31a   : > { %2182 = vmatmul.mubr.msk.f32.vlgmr.msra.gmra.mrb[4].mxu0 %vm223_vm0, %v636_v56 }
 0x3e5   : > { %v2615_v61 = vpop.f32.mrb[2].mxu0 }
 0x3e6   : > { %v2617_v62 = vpop.f32.mrb[3].mxu0 }
 0x3ed   : > { %v2183_v63 = vpop.f32.mrb[4].mxu0 }
 0x3ee   : > { %v725_v1 = vmul.f32 0.17677669, %v2183_v63  ;;  %v715_v2 = vpop.f32.mrb[5].mxu0  ;;  %v2685_v63 = vpack.i.bf16 %v218_v43, %v216_v42 }
 0x3ef   : > { %v724_v4 = vmul.f32 0.17677669, %v715_v2  ;;  %v2689_v2 = vpack.i.bf16 %v222_v60, %v220_v59 }
 0x3f0   : > { %v729_v7 = vsel %vm313_vm2, %v725_v1, -inf }
 0x3f1   : > { %730 = vmax.xlane.f32.xlu0 %v729_v7  ;;  %v726_v8 = vsel %vm313_vm2, %v724_v4, -inf }
 0x3f2   : > { %727 = vmax.xlane.f32.xlu1 %v726_v8 }
 0x403   : > { %841 = vrot.lane.b32.xlu1 %v2538_v3, %s2486_s26 }
 0x407   : > { %2373 = vrot.lane.b32.xlu0 %v2551_v6, %s2486_s26  ;;  %843 = vrot.lane.b32.xlu1 %v2547_v5, %s2486_s26 }
 0x47e   : > { %v731_v9 = vpop.xlane.xlu0 %730 }
 0x47f   : > { %v733_v10 = vsub.f32 %v725_v1, %v731_v9  ;;  %v728_v11 = vpop.xlane.xlu1 %727  ;;  %v2307_v1 = vpack.c.bf16 %v222_v60, %v220_v59 }
 0x480   : > { %v732_v12 = vsub.f32 %v724_v4, %v728_v11 }
 0x481   : > { %v736_v13 = vmul.f32 1.442695, %v733_v10 }
 0x482   : > { %v734_v14 = vmul.f32 1.442695, %v732_v12  ;;  %v2374_v15 = vpop.permute.xlu0 %2373 }
 0x483   : > { %v2376_v16 = vunpack.i.h.bf16 %v2374_v15  ;;  %v2375_v17 = vunpack.i.l.bf16 %v2374_v15  ;;  %v842_v6 = vpop.permute.xlu1 %841 }
 0x484   : > { %2420 = vpow2.f32 %v734_v14 }
 0x485   : > { %2422 = vpow2.f32 %v736_v13  ;;  %v2291_v18 = vpack.c.bf16 %v2376_v16, %v2375_v17 }
 0x487   : > { %2293 = vmatprep.subr.msk.bf16.mxu1 %vm2525_vm1, %v2291_v18  ;;  %v844_v5 = vpop.permute.xlu1 %843 }
 0x48e   : > { %v2629_v3 = vpop.eup %2420 }
 0x48f   : > { %v2631_v19 = vpop.eup %2422  ;;  %2188 = vmatprep.mubr.msk.f32.mxu1 %vm313_vm2, %v2629_v3 }
 0x490   : > { %2189 = vmatmul.mubr.msk.f32.vlgmr.msra.gmra.mrb[4].mxu1 %vm313_vm2, %v2631_v19 }
 0x491   : > { %2296 = vmatpush3.bf16.xpose.msk.msra.mxu1 %vm2525_vm1, %v2291_v18  ;;  %2195 = vmatprep.mubr.msk.f32.mxu1 %vm223_vm0, %v842_v6 }
 0x492   : > { %2308 = vmatprep.subr.bf16.mxu1 %v2307_v1 }
 0x498   : > { %2196 = vmatmul.mubr.msk.f32.vlgmr.msra.gmra.mrb[6].mxu1 %vm223_vm0, %v844_v5 }
 0x499   : > { %2310 = vmatpush3.bf16.msra.mxu1 %v2307_v1 }
 0x563   : > { %v2641_v21 = vpop.f32.mrb[4].mxu1 }
 0x564   : > { %v2643_v22 = vpop.f32.mrb[5].mxu1 }
 0x56b   : > { %v2197_v23 = vpop.f32.mrb[6].mxu1 }
 0x56c   : > { %v933_v24 = vmul.f32 0.17677669, %v2197_v23  ;;  %v923_v25 = vpop.f32.mrb[7].mxu1 }
 0x56d   : > { %v932_v26 = vmul.f32 0.17677669, %v923_v25 }
 0x56e   : > { %v937_v28 = vsel %vm313_vm2, %v933_v24, -inf }
 0x56f   : > { %938 = vmax.xlane.f32.xlu0 %v937_v28  ;;  %v934_v30 = vsel %vm313_vm2, %v932_v26, -inf }
 0x570   : > { %935 = vmax.xlane.f32.xlu1 %v934_v30 }
 0x581   : > { %2378 = vrot.lane.b32.xlu1 %v2571_v20, %s2486_s26 }
 0x585   : > { %1247 = vrot.lane.b32.xlu1 %v2650_v31, %s2484_s21 }
 0x589   : > { %1249 = vrot.lane.b32.xlu1 %v2655_v32, %s2484_s21 }
 0x58d   : > { %2388 = vrot.lane.b32.xlu1 %v2689_v2, %s2484_s21 }
 0x5fc   : > { %v939_v33 = vpop.xlane.xlu0 %938 }
 0x5fd   : > { %v941_v34 = vsub.f32 %v933_v24, %v939_v33  ;;  %v936_v37 = vpop.xlane.xlu1 %935 }
 0x5fe   : > { %v940_v38 = vsub.f32 %v932_v26, %v936_v37 }
 0x5ff   : > { %v944_v39 = vmul.f32 1.442695, %v941_v34 }
 0x600   : > { %v942_v40 = vmul.f32 1.442695, %v940_v38 }
 0x601   : > { %v2379_v41 = vpop.permute.xlu1 %2378 }
 0x602   : > { %2424 = vpow2.f32 %v942_v40  ;;  %v2381_v20 = vunpack.i.h.bf16 %v2379_v41  ;;  %v2380_v44 = vunpack.i.l.bf16 %v2379_v41 }
 0x603   : > { %2426 = vpow2.f32 %v944_v39 }
 0x604   : > { %v2297_v45 = vpack.c.bf16 %v2381_v20, %v2380_v44 }
 0x605   : > { %v1248_v17 = vpop.permute.xlu1 %1247 }
 0x606   : > { %2298 = vmatprep.subr.bf16.mxu0 %v2297_v45 }
 0x607   : > { %2300 = vmatpush3.bf16.msra.mxu0 %v2297_v45 }
 0x608   : > { %2303 = vmatprep.subr.msk.bf16.mxu0 %vm2525_vm1, %v2301_v46 }
 0x609   : > { %v1250_v6 = vpop.permute.xlu1 %1249 }
 0x60c   : > { %v2663_v47 = vpop.eup %2424 }
 0x60d   : > { %v2665_v48 = vpop.eup %2426  ;;  %2202 = vmatprep.mubr.msk.f32.mxu0 %vm313_vm2, %v2663_v47  ;;  %v2389_v5 = vpop.permute.xlu1 %2388 }
 0x60e   : > { %2203 = vmatmul.mubr.msk.f32.vlgmr.msra.gmra.mrb[6].mxu0 %vm313_vm2, %v2665_v48  ;;  %v2391_v23 = vunpack.i.h.bf16 %v2389_v5  ;;  %v2390_v24 = vunpack.i.l.bf16 %v2389_v5 }
 0x60f   : > { %2209 = vmatprep.mubr.msk.f32.mxu0 %vm223_vm0, %v2650_v31 }
 0x610   : > { %2306 = vmatpush3.bf16.xpose.msk.msra.mxu0 %vm2525_vm1, %v2301_v46  ;;  %v2317_v25 = vpack.c.bf16 %v2391_v23, %v2390_v24 }
 0x612   : > { %2318 = vmatprep.subr.bf16.mxu0 %v2317_v25 }
 0x617   : > { %2210 = vmatmul.mubr.msk.f32.vlgmr.msra.gmra.mrb[8].mxu0 %vm223_vm0, %v2655_v32 }
 0x618   : > { %2320 = vmatpush3.bf16.msra.mxu0 %v2317_v25 }
 0x6e1   : > { %v2677_v49 = vpop.f32.mrb[6].mxu0 }
 0x6e2   : > { %v2679_v50 = vpop.f32.mrb[7].mxu0 }
 0x6ea   : > { %v2211_v51 = vpop.f32.mrb[8].mxu0 }
 0x6eb   : > { %v1137_v52 = vmul.f32 0.17677669, %v2211_v51  ;;  %v1127_v54 = vpop.f32.mrb[9].mxu0 }
 0x6ec   : > { %v1136_v56 = vmul.f32 0.17677669, %v1127_v54 }
 0x6ed   : > { %v1141_v57 = vsel %vm313_vm2, %v1137_v52, -inf }
 0x6ee   : > { %1142 = vmax.xlane.f32.xlu0 %v1141_v57  ;;  %v1138_v58 = vsel %vm313_vm2, %v1136_v56, -inf }
 0x6f2   : > { %1139 = vmax.xlane.f32.xlu0 %v1138_v58 }
 0x708   : > { %2383 = vrot.lane.b32.xlu0 %v2685_v63, %s2484_s21 }
 0x77b   : > { %v1143_v4 = vpop.xlane.xlu0 %1142 }
 0x77c   : > { %v1145_v7 = vsub.f32 %v1137_v52, %v1143_v4 }
 0x77e   : > { %v1148_v10 = vmul.f32 1.442695, %v1145_v7 }
 0x77f   : > { %v1140_v8 = vpop.xlane.xlu0 %1139 }
 0x780   : > { %v1144_v9 = vsub.f32 %v1136_v56, %v1140_v8 }
 0x782   : > { %v1146_v11 = vmul.f32 1.442695, %v1144_v9 }
 0x783   : > { %v2384_v12 = vpop.permute.xlu0 %2383 }
 0x784   : > { %2428 = vpow2.f32 %v1146_v11  ;;  %v2386_v13 = vunpack.i.h.bf16 %v2384_v12  ;;  %v2385_v14 = vunpack.i.l.bf16 %v2384_v12 }
 0x785   : > { %2430 = vpow2.f32 %v1148_v10 }
 0x786   : > { %v2311_v15 = vpack.c.bf16 %v2386_v13, %v2385_v14 }
 0x788   : > { %2313 = vmatprep.subr.msk.bf16.mxu1 %vm2525_vm1, %v2311_v15 }
 0x78e   : > { %v2695_v16 = vpop.eup %2428 }
 0x78f   : > { %v2697_v18 = vpop.eup %2430  ;;  %2216 = vmatprep.mubr.msk.f32.mxu1 %vm313_vm2, %v2695_v16 }
 0x790   : > { %2217 = vmatmul.mubr.msk.f32.vlgmr.msra.gmra.mrb[8].mxu1 %vm313_vm2, %v2697_v18 }
 0x791   : > { %2316 = vmatpush3.bf16.xpose.msk.msra.mxu1 %vm2525_vm1, %v2311_v15  ;;  %2223 = vmatprep.mubr.msk.f32.mxu1 %vm223_vm0, %v1248_v17 }
 0x798   : > { %2224 = vmatmul.mubr.msk.f32.vlgmr.msra.gmra.mrb[10].mxu1 %vm223_vm0, %v1250_v6 }
 0x863   : > { %v2707_v26 = vpop.f32.mrb[8].mxu1 }
 0x864   : > { %v2709_v28 = vpop.f32.mrb[9].mxu1 }
 0x86b   : > { %v2225_v30 = vpop.f32.mrb[10].mxu1 }
 0x86c   : > { %v1339_v33 = vmul.f32 0.17677669, %v2225_v30  ;;  %v1329_v34 = vpop.f32.mrb[11].mxu1 }
 0x86d   : > { %v1338_v37 = vmul.f32 0.17677669, %v1329_v34 }
 0x86e   : > { %v1343_v38 = vsel %vm313_vm2, %v1339_v33, -inf }
 0x86f   : > { %1344 = vmax.xlane.f32.xlu0 %v1343_v38  ;;  %v1340_v39 = vsel %vm313_vm2, %v1338_v37, -inf }
 0x870   : > { %1341 = vmax.xlane.f32.xlu1 %v1340_v39 }
 0x881   : > { %1457 = vrot.lane.b32.xlu1 %v2650_v31, %s2485_s25 }
 0x885   : > { %2393 = vrot.lane.b32.xlu0 %v2685_v63, %s2485_s25  ;;  %1459 = vrot.lane.b32.xlu1 %v2655_v32, %s2485_s25 }
 0x8fc   : > { %v1345_v40 = vpop.xlane.xlu0 %1344 }
 0x8fd   : > { %v1347_v41 = vsub.f32 %v1339_v33, %v1345_v40  ;;  %v1342_v42 = vpop.xlane.xlu1 %1341 }
 0x8fe   : > { %v1346_v43 = vsub.f32 %v1338_v37, %v1342_v42 }
 0x8ff   : > { %v1350_v20 = vmul.f32 1.442695, %v1347_v41 }
 0x900   : > { %v1348_v44 = vmul.f32 1.442695, %v1346_v43  ;;  %v2394_v45 = vpop.permute.xlu0 %2393 }
 0x901   : > { %v2396_v46 = vunpack.i.h.bf16 %v2394_v45  ;;  %v2395_v51 = vunpack.i.l.bf16 %v2394_v45  ;;  %v1458_v56 = vpop.permute.xlu1 %1457  ;;  %v531_v45 = vsel %vm313_vm2, %v2605_v55, 0.0 }
 0x902   : > { %2432 = vpow2.f32 %v1348_v44 }
 0x903   : > { %2434 = vpow2.f32 %v1350_v20  ;;  %v2321_v52 = vpack.c.bf16 %v2396_v46, %v2395_v51 }
 0x905   : > { %2323 = vmatprep.subr.msk.bf16.mxu0 %vm2525_vm1, %v2321_v52  ;;  %v1460_v58 = vpop.permute.xlu1 %1459 }
 0x90c   : > { %v2721_v54 = vpop.eup %2432 }
 0x90d   : > { %v2723_v57 = vpop.eup %2434  ;;  %2230 = vmatprep.mubr.msk.f32.mxu0 %vm313_vm2, %v2721_v54  ;;  %v1352_v46 = vsel %vm313_vm2, %v2721_v54, 0.0  ;;  %v946_v54 = vsel %vm313_vm2, %v2663_v47, 0.0 }
 0x90e   : > { %2231 = vmatmul.mubr.msk.f32.vlgmr.msra.gmra.mrb[10].mxu0 %vm313_vm2, %v2723_v57  ;;  %v1355_v51 = vsel %vm313_vm2, %v2723_v57, 0.0  ;;  %v1153_v57 = vsel %vm313_vm2, %v2697_v18, 0.0 }
 0x90f   : > { %2326 = vmatpush3.bf16.xpose.msk.msra.mxu0 %vm2525_vm1, %v2321_v52  ;;  %2237 = vmatprep.mubr.msk.f32.mxu0 %vm223_vm0, %v1458_v56  ;;  %v741_v52 = vsel %vm313_vm2, %v2631_v19, 0.0  ;;  %v949_v56 = vsel %vm313_vm2, %v2665_v48, 0.0  ;;  %v738_v19 = vsel %vm313_vm2, %v2629_v3, 0.0 }
 0x916   : > { %2238 = vmatmul.mubr.msk.f32.vlgmr.msra.gmra.mrb[12].mxu0 %vm223_vm0, %v1460_v58 }
 0x9e1   : > { %v2733_v59 = vpop.f32.mrb[10].mxu0 }
 0x9e2   : > { %v2735_v60 = vpop.f32.mrb[11].mxu0 }
 0x9e9   : > { %v2239_v1 = vpop.f32.mrb[12].mxu0 }
 0x9ea   : > { %v1549_v4 = vmul.f32 0.17677669, %v2239_v1  ;;  %v1539_v7 = vpop.f32.mrb[13].mxu0 }
 0x9eb   : > { %v1548_v8 = vmul.f32 0.17677669, %v1539_v7 }
 0x9ec   : > { %v1553_v9 = vsel %vm313_vm2, %v1549_v4, -inf }
 0x9ed   : > { %1554 = vmax.xlane.f32.xlu1 %v1553_v9  ;;  %v1550_v10 = vsel %vm313_vm2, %v1548_v8, -inf }
 0x9ee   : > { %1551 = vmax.xlane.f32.xlu0 %v1550_v10 }
 0x9fe   : > { %2403 = vrot.lane.b32.xlu1 %v2685_v63, %s2486_s26 }
 0xa02   : > { %1667 = vrot.lane.b32.xlu1 %v2655_v32, %s2486_s26 }
 0xa04   : > { %2398 = vrot.lane.b32.xlu0 %v2689_v2, %s2485_s25 }
 0xa08   : > { %1665 = vrot.lane.b32.xlu0 %v2650_v31, %s2486_s26 }
 0xa7a   : > { %v1555_v11 = vpop.xlane.xlu1 %1554 }
 0xa7b   : > { %v1557_v12 = vsub.f32 %v1549_v4, %v1555_v11  ;;  %v1552_v13 = vpop.xlane.xlu0 %1551 }
 0xa7c   : > { %v1556_v14 = vsub.f32 %v1548_v8, %v1552_v13 }
 0xa7d   : > { %v1560_v15 = vmul.f32 1.442695, %v1557_v12 }
 0xa7e   : > { %v1558_v17 = vmul.f32 1.442695, %v1556_v14  ;;  %v2404_v6 = vpop.permute.xlu1 %2403 }
 0xa7f   : > { %v2399_v5 = vpop.permute.xlu0 %2398  ;;  %v2406_v23 = vunpack.i.h.bf16 %v2404_v6  ;;  %v2405_v24 = vunpack.i.l.bf16 %v2404_v6 }
 0xa80   : > { %2436 = vpow2.f32 %v1558_v17  ;;  %v2401_v63 = vunpack.i.h.bf16 %v2399_v5  ;;  %v2400_v25 = vunpack.i.l.bf16 %v2399_v5 }
 0xa81   : > { %2438 = vpow2.f32 %v1560_v15  ;;  %v2331_v30 = vpack.c.bf16 %v2406_v23, %v2405_v24 }
 0xa82   : > { %v2327_v32 = vpack.c.bf16 %v2401_v63, %v2400_v25  ;;  %v1668_v37 = vpop.permute.xlu1 %1667 }
 0xa83   : > { %v1666_v33 = vpop.permute.xlu0 %1665 }
 0xa84   : > { %2328 = vmatprep.subr.bf16.mxu1 %v2327_v32 }
 0xa85   : > { %2330 = vmatpush3.bf16.msra.mxu1 %v2327_v32  ;;  %v326_v32 = vsel %vm313_vm2, %v2575_v27, 0.0 }
 0xa86   : > { %2333 = vmatprep.subr.msk.bf16.mxu1 %vm2525_vm1, %v2331_v30 }
 0xa8a   : > { %v2437_v31 = vpop.eup %2436 }
 0xa8b   : > { %v2439_v34 = vpop.eup %2438  ;;  %2244 = vmatprep.mubr.msk.f32.mxu1 %vm313_vm2, %v2437_v31  ;;  %v1562_v53 = vsel %vm313_vm2, %v2437_v31, 0.0 }
 0xa8c   : > { %2245 = vmatmul.mubr.msk.f32.vlgmr.msra.gmra.mrb[12].mxu1 %vm313_vm2, %v2439_v34  ;;  %v1565_v55 = vsel %vm313_vm2, %v2439_v34, 0.0 }
 0xa8d   : > { %2251 = vmatprep.mubr.msk.f32.mxu1 %vm223_vm0, %v1666_v33  ;;  %v1150_v33 = vsel %vm313_vm2, %v2695_v16, 0.0 }
 0xa8e   : > { %2336 = vmatpush3.bf16.xpose.msk.msra.mxu1 %vm2525_vm1, %v2331_v30 }
 0xa95   : > { %2252 = vmatmul.mubr.msk.f32.vlgmr.msra.gmra.mrb[14].mxu1 %vm223_vm0, %v1668_v37 }
 0xb5f   : > { %v2755_v38 = vpop.f32.mrb[12].mxu1 }
 0xb60   : > { %v2757_v39 = vpop.f32.mrb[13].mxu1 }
 0xb68   : > { %v2253_v40 = vpop.f32.mrb[14].mxu1 }
 0xb69   : > { %v1757_v41 = vmul.f32 0.17677669, %v2253_v40  ;;  %v1747_v42 = vpop.f32.mrb[15].mxu1 }
 0xb6a   : > { %v1756_v43 = vmul.f32 0.17677669, %v1747_v42 }
 0xb6b   : > { %v1761_v20 = vsel %vm313_vm2, %v1757_v41, -inf }
 0xb6c   : > { %1762 = vmax.xlane.f32.xlu1 %v1761_v20  ;;  %v1758_v44 = vsel %vm313_vm2, %v1756_v43, -inf }
 0xb6d   : > { %1759 = vmax.xlane.f32.xlu0 %v1758_v44 }
 0xb70   : > { %529 = vadd.xlane.f32.xlu1 %v528_v0 }
 0xb74   : > { %532 = vadd.xlane.f32.xlu1 %v531_v45 }
 0xb78   : > { %1353 = vadd.xlane.f32.xlu1 %v1352_v46 }
 0xb7c   : > { %1356 = vadd.xlane.f32.xlu1 %v1355_v51 }
 0xb80   : > { %742 = vadd.xlane.f32.xlu1 %v741_v52 }
 0xb83   : > { %2408 = vrot.lane.b32.xlu0 %v2689_v2, %s2486_s26  ;;  %v329_v2 = vsel %vm313_vm2, %v2579_v29, 0.0 }
 0xb84   : > { %1563 = vadd.xlane.f32.xlu1 %v1562_v53 }
 0xb88   : > { %1566 = vadd.xlane.f32.xlu1 %v1565_v55 }
 0xb8c   : > { %947 = vadd.xlane.f32.xlu1 %v946_v54 }
 0xb90   : > { %950 = vadd.xlane.f32.xlu1 %v949_v56 }
 0xba2   : > { %739 = vadd.xlane.f32.xlu0 %v738_v19 }
 0xba6   : > { %330 = vadd.xlane.f32.xlu0 %v329_v2 }
 0xbaa   : > { %1154 = vadd.xlane.f32.xlu0 %v1153_v57 }
 0xbf9   : > { %v1763_v58 = vpop.xlane.xlu1 %1762 }
 0xbfa   : > { %v1765_v1 = vsub.f32 %v1757_v41, %v1763_v58  ;;  %v1760_v47 = vpop.xlane.xlu0 %1759 }
 0xbfb   : > { %v1764_v4 = vsub.f32 %v1756_v43, %v1760_v47 }
 0xbfc   : > { %v1768_v7 = vmul.f32 1.442695, %v1765_v1 }
 0xbfd   : > { %v1766_v8 = vmul.f32 1.442695, %v1764_v4  ;;  %v530_v48 = vpop.xlane.xlu1 %529 }
 0xbfe   : > { %v2409_v9 = vpop.permute.xlu0 %2408 }
 0xbff   : > { %2440 = vpow2.f32 %v1766_v8  ;;  %v2411_v10 = vunpack.i.h.bf16 %v2409_v9  ;;  %v2410_v3 = vunpack.i.l.bf16 %v2409_v9 }
 0xc00   : > { %2442 = vpow2.f32 %v1768_v7 }
 0xc01   : > { %v2337_v11 = vpack.c.bf16 %v2411_v10, %v2410_v3  ;;  %v533_v12 = vpop.xlane.xlu1 %532 }
 0xc02   : > { %2444 = vrcp.f32 %v533_v12 }
 0xc03   : > { %2338 = vmatprep.subr.bf16.mxu0 %v2337_v11  ;;  %2446 = vrcp.f32 %v530_v48 }
 0xc04   : > { %2340 = vmatpush3.bf16.msra.mxu0 %v2337_v11 }
 0xc05   : > { %v1354_v29 = vpop.xlane.xlu1 %1353 }
 0xc06   : > { %2448 = vrcp.f32 %v1354_v29 }
 0xc09   : > { %v2441_v18 = vpop.eup %2440  ;;  %v1357_v13 = vpop.xlane.xlu1 %1356 }
 0xc0a   : > { %v2443_v14 = vpop.eup %2442  ;;  %2258 = vmatprep.mubr.msk.f32.mxu0 %vm313_vm2, %v2441_v18  ;;  %v1770_v15 = vsel %vm313_vm2, %v2441_v18, 0.0  ;;  %2450 = vrcp.f32 %v1357_v13 }
 0xc0b   : > { %1771 = vadd.xlane.f32.xlu1 %v1770_v15  ;;  %2259 = vmatmul.mubr.msk.f32.vlgmr.msra.gmra.mrb[14].mxu0 %vm313_vm2, %v2443_v14  ;;  %v1773_v23 = vsel %vm313_vm2, %v2443_v14, 0.0 }
 0xc0c   : > { %v2445_v17 = vpop.eup %2444 }
 0xc0d   : > { %v626_v6 = vmul.f32 %v2445_v17, %v533_v12  ;;  %v743_v5 = vpop.xlane.xlu1 %742  ;;  %v2447_v34 = vpop.eup %2446 }
 0xc0e   : > { %2452 = vrcp.f32 %v743_v5  ;;  %v625_v40 = vmul.f32 %v2447_v34, %v530_v48 }
 0xc0f   : > { %v628_v24 = vsub.f32 2.0, %v626_v6  ;;  %1774 = vadd.xlane.f32.xlu1 %v1773_v23 }
 0xc10   : > { %v2449_v41 = vpop.eup %2448  ;;  %v627_v42 = vsub.f32 2.0, %v625_v40 }
 0xc11   : > { %v630_v63 = vmul.f32 %v2445_v17, %v628_v24  ;;  %v1564_v25 = vpop.xlane.xlu1 %1563  ;;  %v1449_v43 = vmul.f32 %v2449_v41, %v1354_v29 }
 0xc13   : > { %327 = vadd.xlane.f32.xlu1 %v326_v32  ;;  %v632_v30 = vmul.f32 %v2615_v61, %v630_v63  ;;  %v629_v61 = vmul.f32 %v2447_v34, %v627_v42  ;;  %v1451_v44 = vsub.f32 2.0, %v1449_v43 }
 0xc14   : > { %v2451_v20 = vpop.eup %2450 }
 0xc15   : > { %v1567_v31 = vpop.xlane.xlu1 %1566  ;;  %1877 = vrot.lane.b32.xlu0 %v632_v30, %s2486_s26  ;;  %v1450_v0 = vmul.f32 %v2451_v20, %v1357_v13  ;;  %v1453_v46 = vmul.f32 %v2449_v41, %v1451_v44  ;;  %v631_v16 = vmul.f32 %v629_v61, %v2617_v62 }
 0xc16   : > { %2454 = vrcp.f32 %v1567_v31 }
 0xc17   : > { %1151 = vadd.xlane.f32.xlu1 %v1150_v33  ;;  %v1452_v51 = vsub.f32 2.0, %v1450_v0  ;;  %v1455_v19 = vmul.f32 %v1453_v46, %v2735_v60 }
 0xc18   : > { %v2453_v45 = vpop.eup %2452 }
 0xc19   : > { %v948_v37 = vpop.xlane.xlu1 %947  ;;  %v834_v52 = vmul.f32 %v2453_v45, %v743_v5  ;;  %v1454_v55 = vmul.f32 %v2451_v20, %v1452_v51 }
 0xc1b   : > { %v836_v54 = vsub.f32 2.0, %v834_v52  ;;  %v1456_v47 = vmul.f32 %v2733_v59, %v1454_v55 }
 0xc1d   : > { %v951_v27 = vpop.xlane.xlu1 %950  ;;  %v838_v57 = vmul.f32 %v2453_v45, %v836_v54 }
 0xc1e   : > { %2456 = vrcp.f32 %v951_v27 }
 0xc1f   : > { %2458 = vrcp.f32 %v1564_v25  ;;  %v840_v8 = vmul.f32 %v2641_v21, %v838_v57 }
 0xc20   : > { %v2455_v53 = vpop.eup %2454  ;;  %2460 = vrcp.f32 %v948_v37 }
 0xc21   : > { %v1658_v56 = vmul.f32 %v2455_v53, %v1567_v31 }
 0xc23   : > { %v1660_v58 = vsub.f32 2.0, %v1658_v56 }
 0xc25   : > { %v1662_v62 = vmul.f32 %v2455_v53, %v1660_v58 }
 0xc27   : > { %v1664_v9 = vmul.f32 %v2755_v38, %v1662_v62 }
 0xc28   : > { %1875 = vrot.lane.b32.xlu1 %v631_v16, %s2486_s26  ;;  %v2457_v2 = vpop.eup %2456 }
 0xc29   : > { %v1042_v1 = vmul.f32 %v2457_v2, %v951_v27  ;;  %v2459_v60 = vpop.eup %2458 }
 0xc2a   : > { %v2461_v10 = vpop.eup %2460  ;;  %v1657_v3 = vmul.f32 %v2459_v60, %v1564_v25 }
 0xc2b   : > { %v1044_v7 = vsub.f32 2.0, %v1042_v1  ;;  %v1041_v18 = vmul.f32 %v2461_v10, %v948_v37 }
 0xc2c   : > { %1899 = vrot.lane.b32.xlu1 %v1455_v19, %s2486_s26  ;;  %v1659_v29 = vsub.f32 2.0, %v1657_v3 }
 0xc2d   : > { %v1046_v48 = vmul.f32 %v2457_v2, %v1044_v7  ;;  %v1043_v15 = vsub.f32 2.0, %v1041_v18 }
 0xc2e   : > { %v1661_v14 = vmul.f32 %v2459_v60, %v1659_v29 }
 0xc2f   : > { %v740_v4 = vpop.xlane.xlu0 %739  ;;  %v1048_v11 = vmul.f32 %v2677_v49, %v1046_v48  ;;  %v1045_v38 = vmul.f32 %v2461_v10, %v1043_v15 }
 0xc30   : > { %2462 = vrcp.f32 %v740_v4  ;;  %1901 = vrot.lane.b32.xlu1 %v1456_v47, %s2486_s26  ;;  %v1663_v6 = vmul.f32 %v1661_v14, %v2757_v39 }
 0xc31   : > { %v1047_v49 = vmul.f32 %v1045_v38, %v2679_v50 }
 0xc33   : > { %v331_v5 = vpop.xlane.xlu0 %330 }
 0xc34   : > { %1885 = vrot.lane.b32.xlu1 %v840_v8, %s2485_s25 }
 0xc37   : > { %v1155_v23 = vpop.xlane.xlu0 %1154 }
 0xc38   : > { %1909 = vrot.lane.b32.xlu1 %v1664_v9, %s2485_s25  ;;  %2464 = vrcp.f32 %v1155_v23 }
 0xc39   : > { %2466 = vrcp.f32 %v331_v5 }
 0xc3a   : > { %v2463_v59 = vpop.eup %2462 }
 0xc3b   : > { %v833_v12 = vmul.f32 %v2463_v59, %v740_v4 }
 0xc3c   : > { %1893 = vrot.lane.b32.xlu1 %v1048_v11, %s2484_s21 }
 0xc3d   : > { %v835_v13 = vsub.f32 2.0, %v833_v12 }
 0xc3f   : > { %v837_v21 = vmul.f32 %v2463_v59, %v835_v13 }
 0xc41   : > { %v839_v17 = vmul.f32 %v837_v21, %v2643_v22 }
 0xc42   : > { %v2465_v25 = vpop.eup %2464 }
 0xc43   : > { %1883 = vrot.lane.b32.xlu0 %v839_v17, %s2485_s25  ;;  %v1240_v22 = vmul.f32 %v2465_v25, %v1155_v23  ;;  %v2467_v33 = vpop.eup %2466 }
 0xc44   : > { %v416_v41 = vmul.f32 %v2467_v33, %v331_v5 }
 0xc45   : > { %v1242_v31 = vsub.f32 2.0, %v1240_v22 }
 0xc46   : > { %v418_v44 = vsub.f32 2.0, %v416_v41 }
 0xc47   : > { %1907 = vrot.lane.b32.xlu0 %v1663_v6, %s2485_s25  ;;  %v1244_v37 = vmul.f32 %v2465_v25, %v1242_v31 }
 0xc48   : > { %v420_v53 = vmul.f32 %v2467_v33, %v418_v44 }
 0xc49   : > { %v1246_v27 = vmul.f32 %v2707_v26, %v1244_v37 }
 0xc4a   : > { %v422_v2 = vmul.f32 %v2587_v35, %v420_v53 }
 0xc4b   : > { %1891 = vrot.lane.b32.xlu0 %v1047_v49, %s2484_s21 }
 0xc87   : > { %v1878_v0 = vpop.permute.xlu0 %1877 }
 0xc88   : > { %v1922_v4 = vsel %vm223_vm0, %v422_v2, %v1878_v0 }
 0xc98   : > { %v1772_v24 = vpop.xlane.xlu1 %1771 }
 0xc9c   : > { %v1775_v63 = vpop.xlane.xlu1 %1774 }
 0xca0   : > { %v328_v32 = vpop.xlane.xlu1 %327 }
 0xca1   : > { %2468 = vrcp.f32 %v328_v32 }
 0xca4   : > { %v1152_v30 = vpop.xlane.xlu1 %1151 }
 0xca5   : > { %2470 = vrcp.f32 %v1152_v30 }
 0xca6   : > { %2472 = vrcp.f32 %v1775_v63 }
 0xca7   : > { %2474 = vrcp.f32 %v1772_v24 }
 0xca8   : > { %v1876_v39 = vpop.permute.xlu1 %1875 }
 0xcab   : > { %v2469_v34 = vpop.eup %2468 }
 0xcac   : > { %v415_v50 = vmul.f32 %v2469_v34, %v328_v32  ;;  %v1900_v40 = vpop.permute.xlu1 %1899 }
 0xcae   : > { %v417_v42 = vsub.f32 2.0, %v415_v50 }
 0xcaf   : > { %v2471_v43 = vpop.eup %2470 }
 0xcb0   : > { %v1239_v20 = vmul.f32 %v2471_v43, %v1152_v30  ;;  %v1902_v61 = vpop.permute.xlu1 %1901  ;;  %v419_v46 = vmul.f32 %v2469_v34, %v417_v42  ;;  %v2473_v60 = vpop.eup %2472 }
 0xcb1   : > { %v1930_v45 = vsel %vm223_vm0, %v1246_v27, %v1902_v61  ;;  %v2475_v48 = vpop.eup %2474  ;;  %v1866_v9 = vmul.f32 %v2473_v60, %v1775_v63 }
 0xcb2   : > { %v1241_v51 = vsub.f32 2.0, %v1239_v20  ;;  %v421_v54 = vmul.f32 %v419_v46, %v2589_v36  ;;  %v1865_v10 = vmul.f32 %v2475_v48, %v1772_v24 }
 0xcb3   : > { %v1868_v3 = vsub.f32 2.0, %v1866_v9 }
 0xcb4   : > { %v1243_v52 = vmul.f32 %v2471_v43, %v1241_v51  ;;  %v1886_v16 = vpop.permute.xlu1 %1885  ;;  %v1921_v1 = vsel %vm223_vm0, %v421_v54, %v1876_v39  ;;  %v1867_v59 = vsub.f32 2.0, %v1865_v10 }
 0xcb5   : > { %v1884_v55 = vpop.permute.xlu0 %1883  ;;  %v1925_v36 = vsel %vm1923_vm3, %v1922_v4, %v1886_v16  ;;  %v1870_v11 = vmul.f32 %v2473_v60, %v1868_v3 }
 0xcb6   : > { %v1245_v56 = vmul.f32 %v1243_v52, %v2709_v28  ;;  %v1924_v62 = vsel %vm1923_vm3, %v1921_v1, %v1884_v55  ;;  %v1869_v29 = vmul.f32 %v2475_v48, %v1867_v59 }
 0xcb8   : > { %v1929_v19 = vsel %vm223_vm0, %v1245_v56, %v1900_v40  ;;  %v1910_v26 = vpop.permute.xlu1 %1909 }
 0xcb9   : > { %v1932_v57 = vsel %vm1923_vm3, %v1930_v45, %v1910_v26  ;;  %v1908_v58 = vpop.permute.xlu0 %1907 }
 0xcba   : > { %v1931_v47 = vsel %vm1923_vm3, %v1929_v19, %v1908_v58 }
 0xcbc   : > { %v1894_v28 = vpop.permute.xlu1 %1893 }
 0xcbd   : > { %v1928_v7 = vsel %vm1926_vm4, %v1925_v36, %v1894_v28  ;;  %v1892_v8 = vpop.permute.xlu0 %1891 }
 0xcbe   : > { %1937 = vst [vmem:[%s210_s29 + $0x10] sm:$0xff] %v1928_v7  ;;  %v1927_v35 = vsel %vm1926_vm4, %v1924_v62, %v1892_v8 }
 0xcbf   : > { %1935 = vst [vmem:[%s210_s29] sm:$0xff] %v1927_v35 }
 0xcde   : > { %v2260_v12 = vpop.f32.mrb[14].mxu0 }
 0xcdf   : > { %v1872_v18 = vmul.f32 %v2260_v12, %v1870_v11  ;;  %v1854_v13 = vpop.f32.mrb[15].mxu0 }
 0xce0   : > { %v1871_v21 = vmul.f32 %v1869_v29, %v1854_v13 }
 0xce1   : > { %1917 = vrot.lane.b32.xlu1 %v1872_v18, %s2484_s21 }
 0xce2   : > { %1915 = vrot.lane.b32.xlu0 %v1871_v21, %s2484_s21 }
 0xd53   : > { %v1918_v14 = vpop.permute.xlu1 %1917 }
 0xd54   : > { %v1934_v15 = vsel %vm1926_vm4, %v1932_v57, %v1918_v14  ;;  %v1916_v17 = vpop.permute.xlu0 %1915 }
 0xd55   : > { %1938 = vst [vmem:[%s210_s29 + $0x18] sm:$0xff] %v1934_v15  ;;  %v1933_v38 = vsel %vm1926_vm4, %v1931_v47, %v1916_v17 }
 0xd56   : > { %1936 = vst [vmem:[%s210_s29 + $0x8] sm:$0xff] %v1933_v38 }
 0xd57 PF: > { %s13_s12 = sadd.s32 1, %s2482_s12  }
 0xd58   : > { %p10_p4 = scmp.ge.s32.totalorder %s13_s12, 4  }
 0xd5a   :  { %12 = sbr.rel (!%p10_p4) target bundleno = 1 (0x1), region = 68 }

</bundles_post_ra>
